<compile_context>
chip_gen: v7x
topology: tpu7x:2x2x1
jax: 0.10.0
libtpu: 0.0.40
codegen_flags: <defaults>
</compile_context>

<pallas_src>
import functools

import jax
import jax.numpy as jnp
from jax.experimental import pallas as pl
from jax.experimental.pallas import tpu as pltpu

LANE = 128        # TPU lane width
SUBLANE = 8       # f32 sublane multiple
MAX_TILE_B = 256  # cap on batch rows per grid step (VMEM/overhead sweet spot)


def _device_kind():
    try:
        return jax.devices()[0].device_kind.lower()
    except Exception:  # pragma: no cover - keeps tracing usable off-TPU
        return ""


_KIND = _device_kind()
_IS_V5 = "v5" in _KIND          # v5e/v5p: no bf16 VALU -> keep f32 elementwise
_HAS_TWO_TC = "v7" in _KIND     # v7x: 2 TensorCores per chip
_BF16_ELEMENTWISE = not _IS_V5


def _round_up(n, m):
    return -(-n // m) * m


def _choose_tile_b(batch):
    """Adaptive batch tile: sublane-rounded for tiny batches, split across the
    two v7x TensorCores when there is enough work, capped at MAX_TILE_B."""
    pb = _round_up(batch, SUBLANE)
    if _HAS_TWO_TC and pb > SUBLANE:
        pb = _round_up(-(-pb // 2), SUBLANE)
    return min(pb, MAX_TILE_B)


def _dqn_mlp_kernel(x_ref, w1_ref, b1_ref, w2_ref, b2_ref,
                    w3_ref, b3_ref, w4_ref, b4_ref, o_ref,
                    *, bf16_elementwise):
    """Fused MLP forward for one batch tile: (Linear -> ReLU) x 3 -> Linear.

    Weights are bf16 (MXU-native), accumulation is f32.  Bias-add/ReLU run in
    bf16 on chips with a bf16 VALU (v6e/v7x) and in f32 on v5-class chips.
    """
    def act(acc, b_ref):
        if bf16_elementwise:
            return jnp.maximum(
                acc.astype(jnp.bfloat16) + b_ref[...].astype(jnp.bfloat16), 0)
        return jnp.maximum(acc + b_ref[...], 0.0).astype(jnp.bfloat16)

    h = x_ref[...].astype(jnp.bfloat16)
    h = act(jnp.dot(h, w1_ref[...], preferred_element_type=jnp.float32), b1_ref)
    h = act(jnp.dot(h, w2_ref[...], preferred_element_type=jnp.float32), b2_ref)
    h = act(jnp.dot(h, w3_ref[...], preferred_element_type=jnp.float32), b3_ref)
    out = jnp.dot(h, w4_ref[...], preferred_element_type=jnp.float32) + b4_ref[...]
    o_ref[...] = out.astype(o_ref.dtype)


def _const_spec(shape):
    """Full-array block identical for every batch grid step: weights/biases
    stay VMEM-resident, loaded once."""
    n = len(shape)
    return pl.BlockSpec(shape, lambda b, _n=n: (0,) * _n)


@functools.partial(jax.jit, static_argnames=("action_size",))
def dqn_forward(x, packed_params, action_size):
    """Run the fused DQN MLP forward pass as a Pallas kernel tiled over batch."""
    (w1, b1), (w2, b2), (w3, b3), (w4, b4) = packed_params
    batch, state_size = x.shape
    padded_state = w1.shape[0]        # state_size padded to a lane multiple
    padded_out = w4.shape[1]          # action_size padded to a lane multiple

    tile_b = _choose_tile_b(batch)
    padded_batch = _round_up(batch, tile_b)

    pad_rows = padded_batch - batch
    pad_cols = padded_state - state_size
    if pad_rows or pad_cols:
        x = jnp.pad(x, ((0, pad_rows), (0, pad_cols)))

    grid = (padded_batch // tile_b,)
    kernel = functools.partial(_dqn_mlp_kernel,
                               bf16_elementwise=_BF16_ELEMENTWISE)

    out = pl.pallas_call(
        kernel,
        out_shape=jax.ShapeDtypeStruct((padded_batch, padded_out), jnp.float32),
        grid=grid,
        in_specs=[
            pl.BlockSpec((tile_b, padded_state), lambda b: (b, 0)),
            _const_spec(w1.shape), _const_spec(b1.shape),
            _const_spec(w2.shape), _const_spec(b2.shape),
            _const_spec(w3.shape), _const_spec(b3.shape),
            _const_spec(w4.shape), _const_spec(b4.shape),
        ],
        out_specs=pl.BlockSpec((tile_b, padded_out), lambda b: (b, 0)),
        compiler_params=pltpu.CompilerParams(
            dimension_semantics=("parallel",),
            vmem_limit_bytes=16 << 20,
        ),
    )(x, w1, b1, w2, b2, w3, b3, w4, b4)

    return out[:batch, :action_size]


def init_dqn_params(key, state_size, action_size, hidden_sizes=None):
    """He (kaiming_normal, fan_in, relu) init, bias = 0.01 — matches
    DQNNetwork._initialize_weights. Weights stored as (in, out), f32."""
    if hidden_sizes is None:
        hidden_sizes = [512, 512, 256]
    dims = [state_size] + list(hidden_sizes) + [action_size]
    params = []
    for fan_in, fan_out in zip(dims[:-1], dims[1:]):
        key, wk = jax.random.split(key)
        std = jnp.sqrt(2.0 / fan_in)  # kaiming_normal_, mode='fan_in', 'relu'
        w = jax.random.normal(wk, (fan_in, fan_out), dtype=jnp.float32) * std
        b = jnp.full((1, fan_out), 0.01, dtype=jnp.float32)
        params.append((w, b))
    return params


def pack_params_for_kernel(params):
    """Cast weights to bf16 (biases stay f32), lane-pad the first layer's input
    dim and the final layer's output dim so every block is lane-dense."""
    (w1, b1), *mid, (wl, bl) = params
    state_size = w1.shape[0]
    action_size = wl.shape[1]

    pad_s = (-state_size) % LANE
    if pad_s:
        w1 = jnp.pad(w1, ((0, pad_s), (0, 0)))      # zero rows: math unchanged
    pad_a = (-action_size) % LANE
    if pad_a:
        wl = jnp.pad(wl, ((0, 0), (0, pad_a)))
        bl = jnp.pad(bl, ((0, 0), (0, pad_a)))

    layers = [(w1, b1)] + mid + [(wl, bl)]
    packed = tuple((w.astype(jnp.bfloat16), b.astype(jnp.float32))
                   for (w, b) in layers)
    return packed, action_size


def dqn_forward_reference(x, packed_params, action_size,
                          bf16_elementwise=_BF16_ELEMENTWISE):
    """Pure-JAX reference replicating the kernel's precision path."""
    w1 = packed_params[0][0]
    pad_cols = w1.shape[0] - x.shape[1]
    if pad_cols:
        x = jnp.pad(x, ((0, 0), (0, pad_cols)))
    h = x.astype(jnp.bfloat16)
    n = len(packed_params)
    out = None
    for i, (w, b) in enumerate(packed_params):
        acc = jnp.dot(h, w, preferred_element_type=jnp.float32)
        if i < n - 1:
            if bf16_elementwise:
                h = jnp.maximum(acc.astype(jnp.bfloat16) + b.astype(jnp.bfloat16), 0)
            else:
                h = jnp.maximum(acc + b, 0.0).astype(jnp.bfloat16)
        else:
            out = acc + b
    return out[:, :action_size]


if __name__ == "__main__":
    # Shapes consistent with the module's forward:
    # state vector input (batch, state_size) -> Q-values (batch, action_size).
    batch = 8
    state_size = 32
    action_size = 8
    hidden_sizes = [512, 512, 256]

    key = jax.random.PRNGKey(0)
    key, xk = jax.random.split(key)
    x = jax.random.normal(xk, (batch, state_size), dtype=jnp.float32)

    params = init_dqn_params(key, state_size, action_size, hidden_sizes)
    packed_params, action_size = pack_params_for_kernel(params)

    q_values = dqn_forward(x, packed_params, action_size)
    q_values = jax.block_until_ready(q_values)

    # Verify against pure-JAX reference (same bf16 precision path).
    q_ref = dqn_forward_reference(x, packed_params, action_size)
    assert q_values.shape == (batch, action_size)
    assert jnp.allclose(q_values, q_ref, atol=5e-2, rtol=5e-2), "mismatch vs reference"

    print("KERNEL_OK")
</pallas_src>

<mosaic_0001>
module attributes {stable_mosaic.version = 11 : i64} {
  func.func @_dqn_mlp_kernel(%arg0: i32, %arg1: memref<8x128xf32, #tpu.memory_space<vmem>>, %arg2: memref<128x512xbf16, #tpu.memory_space<vmem>>, %arg3: memref<1x512xf32, #tpu.memory_space<vmem>>, %arg4: memref<512x512xbf16, #tpu.memory_space<vmem>>, %arg5: memref<1x512xf32, #tpu.memory_space<vmem>>, %arg6: memref<512x256xbf16, #tpu.memory_space<vmem>>, %arg7: memref<1x256xf32, #tpu.memory_space<vmem>>, %arg8: memref<256x128xbf16, #tpu.memory_space<vmem>>, %arg9: memref<1x128xf32, #tpu.memory_space<vmem>>, %arg10: memref<8x128xf32, #tpu.memory_space<vmem>>) attributes {dimension_semantics = [#tpu.dimension_semantics<parallel>], iteration_bounds = array<i64: 1>, scalar_prefetch = 0 : i64, scratch_operands = 0 : i64, tpu.core_type = #tpu.core_type<tc>, window_params = [{transform_indices = @transform_0, window_bounds = array<i64: 8, 128>}, {pipeline_mode = #tpu.pipeline_mode<synchronous>, transform_indices = @transform_1, window_bounds = array<i64: 128, 512>}, {pipeline_mode = #tpu.pipeline_mode<synchronous>, transform_indices = @transform_2, window_bounds = array<i64: 1, 512>}, {pipeline_mode = #tpu.pipeline_mode<synchronous>, transform_indices = @transform_3, window_bounds = array<i64: 512, 512>}, {pipeline_mode = #tpu.pipeline_mode<synchronous>, transform_indices = @transform_4, window_bounds = array<i64: 1, 512>}, {pipeline_mode = #tpu.pipeline_mode<synchronous>, transform_indices = @transform_5, window_bounds = array<i64: 512, 256>}, {pipeline_mode = #tpu.pipeline_mode<synchronous>, transform_indices = @transform_6, window_bounds = array<i64: 1, 256>}, {pipeline_mode = #tpu.pipeline_mode<synchronous>, transform_indices = @transform_7, window_bounds = array<i64: 256, 128>}, {pipeline_mode = #tpu.pipeline_mode<synchronous>, transform_indices = @transform_8, window_bounds = array<i64: 1, 128>}, {transform_indices = @transform_9, window_bounds = array<i64: 8, 128>}]} {
    %c0 = arith.constant 0 : index
    %c0_0 = arith.constant 0 : index
    %0 = vector.load %arg1[%c0, %c0_0] : memref<8x128xf32, #tpu.memory_space<vmem>>, vector<8x128xf32>
    %1 = arith.truncf %0 : vector<8x128xf32> to vector<8x128xbf16>
    %c0_1 = arith.constant 0 : index
    %c0_2 = arith.constant 0 : index
    %2 = vector.load %arg2[%c0_1, %c0_2] : memref<128x512xbf16, #tpu.memory_space<vmem>>, vector<128x512xbf16>
    %cst = arith.constant dense<0.000000e+00> : vector<8x512xf32>
    %3 = tpu.matmul %1, %2, %cst {dimension_numbers = #tpu.dot_dimension_numbers<[1], [0], [0], [1], [0, 0, 1, 1], [], []>} : vector<8x128xbf16>, vector<128x512xbf16>, vector<8x512xf32> -> vector<8x512xf32>
    %4 = arith.truncf %3 : vector<8x512xf32> to vector<8x512xbf16>
    %c0_3 = arith.constant 0 : index
    %c0_4 = arith.constant 0 : index
    %5 = vector.load %arg3[%c0_3, %c0_4] : memref<1x512xf32, #tpu.memory_space<vmem>>, vector<1x512xf32>
    %6 = arith.truncf %5 : vector<1x512xf32> to vector<1x512xbf16>
    %7 = vector.broadcast %6 : vector<1x512xbf16> to vector<8x512xbf16>
    %8 = arith.addf %4, %7 : vector<8x512xbf16>
    %cst_5 = arith.constant 0.000000e+00 : bf16
    %9 = vector.broadcast %cst_5 : bf16 to vector<8x512xbf16>
    %10 = arith.maximumf %8, %9 : vector<8x512xbf16>
    %c0_6 = arith.constant 0 : index
    %c0_7 = arith.constant 0 : index
    %11 = vector.load %arg4[%c0_6, %c0_7] : memref<512x512xbf16, #tpu.memory_space<vmem>>, vector<512x512xbf16>
    %cst_8 = arith.constant dense<0.000000e+00> : vector<8x512xf32>
    %12 = tpu.matmul %10, %11, %cst_8 {dimension_numbers = #tpu.dot_dimension_numbers<[1], [0], [0], [1], [0, 0, 1, 1], [], []>} : vector<8x512xbf16>, vector<512x512xbf16>, vector<8x512xf32> -> vector<8x512xf32>
    %13 = arith.truncf %12 : vector<8x512xf32> to vector<8x512xbf16>
    %c0_9 = arith.constant 0 : index
    %c0_10 = arith.constant 0 : index
    %14 = vector.load %arg5[%c0_9, %c0_10] : memref<1x512xf32, #tpu.memory_space<vmem>>, vector<1x512xf32>
    %15 = arith.truncf %14 : vector<1x512xf32> to vector<1x512xbf16>
    %16 = vector.broadcast %15 : vector<1x512xbf16> to vector<8x512xbf16>
    %17 = arith.addf %13, %16 : vector<8x512xbf16>
    %cst_11 = arith.constant 0.000000e+00 : bf16
    %18 = vector.broadcast %cst_11 : bf16 to vector<8x512xbf16>
    %19 = arith.maximumf %17, %18 : vector<8x512xbf16>
    %c0_12 = arith.constant 0 : index
    %c0_13 = arith.constant 0 : index
    %20 = vector.load %arg6[%c0_12, %c0_13] : memref<512x256xbf16, #tpu.memory_space<vmem>>, vector<512x256xbf16>
    %cst_14 = arith.constant dense<0.000000e+00> : vector<8x256xf32>
    %21 = tpu.matmul %19, %20, %cst_14 {dimension_numbers = #tpu.dot_dimension_numbers<[1], [0], [0], [1], [0, 0, 1, 1], [], []>} : vector<8x512xbf16>, vector<512x256xbf16>, vector<8x256xf32> -> vector<8x256xf32>
    %22 = arith.truncf %21 : vector<8x256xf32> to vector<8x256xbf16>
    %c0_15 = arith.constant 0 : index
    %c0_16 = arith.constant 0 : index
    %23 = vector.load %arg7[%c0_15, %c0_16] : memref<1x256xf32, #tpu.memory_space<vmem>>, vector<1x256xf32>
    %24 = arith.truncf %23 : vector<1x256xf32> to vector<1x256xbf16>
    %25 = vector.broadcast %24 : vector<1x256xbf16> to vector<8x256xbf16>
    %26 = arith.addf %22, %25 : vector<8x256xbf16>
    %cst_17 = arith.constant 0.000000e+00 : bf16
    %27 = vector.broadcast %cst_17 : bf16 to vector<8x256xbf16>
    %28 = arith.maximumf %26, %27 : vector<8x256xbf16>
    %c0_18 = arith.constant 0 : index
    %c0_19 = arith.constant 0 : index
    %29 = vector.load %arg8[%c0_18, %c0_19] : memref<256x128xbf16, #tpu.memory_space<vmem>>, vector<256x128xbf16>
    %cst_20 = arith.constant dense<0.000000e+00> : vector<8x128xf32>
    %30 = tpu.matmul %28, %29, %cst_20 {dimension_numbers = #tpu.dot_dimension_numbers<[1], [0], [0], [1], [0, 0, 1, 1], [], []>} : vector<8x256xbf16>, vector<256x128xbf16>, vector<8x128xf32> -> vector<8x128xf32>
    %c0_21 = arith.constant 0 : index
    %c0_22 = arith.constant 0 : index
    %31 = vector.load %arg9[%c0_21, %c0_22] : memref<1x128xf32, #tpu.memory_space<vmem>>, vector<1x128xf32>
    %32 = vector.broadcast %31 : vector<1x128xf32> to vector<8x128xf32>
    %33 = arith.addf %30, %32 : vector<8x128xf32>
    %c0_23 = arith.constant 0 : index
    %c0_24 = arith.constant 0 : index
    %34 = vector.load %arg10[%c0_23, %c0_24] : memref<8x128xf32, #tpu.memory_space<vmem>>, vector<8x128xf32>
    tpu.vector_store %arg10[%c0_23, %c0_24], %33 {strides = array<i32>} : memref<8x128xf32, #tpu.memory_space<vmem>>, vector<8x128xf32>,
    return
  }
  func.func @transform_0(%arg0: i32) -> (i32, i32) {
    %c0_i32 = arith.constant 0 : i32
    %c0_i32_0 = arith.constant 0 : i32
    return %arg0, %c0_i32 : i32, i32
  }
  func.func @transform_1(%arg0: i32) -> (i32, i32) {
    %c0_i32 = arith.constant 0 : i32
    %c0_i32_0 = arith.constant 0 : i32
    %c0_i32_1 = arith.constant 0 : i32
    return %c0_i32, %c0_i32_0 : i32, i32
  }
  func.func @transform_2(%arg0: i32) -> (i32, i32) {
    %c0_i32 = arith.constant 0 : i32
    %c0_i32_0 = arith.constant 0 : i32
    %c0_i32_1 = arith.constant 0 : i32
    return %c0_i32, %c0_i32_0 : i32, i32
  }
  func.func @transform_3(%arg0: i32) -> (i32, i32) {
    %c0_i32 = arith.constant 0 : i32
    %c0_i32_0 = arith.constant 0 : i32
    %c0_i32_1 = arith.constant 0 : i32
    return %c0_i32, %c0_i32_0 : i32, i32
  }
  func.func @transform_4(%arg0: i32) -> (i32, i32) {
    %c0_i32 = arith.constant 0 : i32
    %c0_i32_0 = arith.constant 0 : i32
    %c0_i32_1 = arith.constant 0 : i32
    return %c0_i32, %c0_i32_0 : i32, i32
  }
  func.func @transform_5(%arg0: i32) -> (i32, i32) {
    %c0_i32 = arith.constant 0 : i32
    %c0_i32_0 = arith.constant 0 : i32
    %c0_i32_1 = arith.constant 0 : i32
    return %c0_i32, %c0_i32_0 : i32, i32
  }
  func.func @transform_6(%arg0: i32) -> (i32, i32) {
    %c0_i32 = arith.constant 0 : i32
    %c0_i32_0 = arith.constant 0 : i32
    %c0_i32_1 = arith.constant 0 : i32
    return %c0_i32, %c0_i32_0 : i32, i32
  }
  func.func @transform_7(%arg0: i32) -> (i32, i32) {
    %c0_i32 = arith.constant 0 : i32
    %c0_i32_0 = arith.constant 0 : i32
    %c0_i32_1 = arith.constant 0 : i32
    return %c0_i32, %c0_i32_0 : i32, i32
  }
  func.func @transform_8(%arg0: i32) -> (i32, i32) {
    %c0_i32 = arith.constant 0 : i32
    %c0_i32_0 = arith.constant 0 : i32
    %c0_i32_1 = arith.constant 0 : i32
    return %c0_i32, %c0_i32_0 : i32, i32
  }
  func.func @transform_9(%arg0: i32) -> (i32, i32) {
    %c0_i32 = arith.constant 0 : i32
    %c0_i32_0 = arith.constant 0 : i32
    return %arg0, %c0_i32 : i32, i32
  }
}

</mosaic_0001>

<bundles_post_ra>
// kernel: dqn_forward.1
= control target key start
LH: loop header
LB: loop body
LE: loop exit
PB: predicated region body
PF: predicated region fallthrough
CT: control target
= control target key end

     0   :  { %14 = vsyncpa [#allocation3], 0  ;;  %s3079_s0 = inlined_call_operand.vmem [shape: f32[8,128], index: 0, kind: input, shape index: {}]   ;;  %s3080_s1 = inlined_call_operand.hbm [shape: bf16[128,512], index: 1, kind: input, shape index: {}]   ;;  %s3081_s2 = inlined_call_operand.vmem [shape: f32[1,512], index: 2, kind: input, shape index: {}]   ;;  %s3082_s3 = inlined_call_operand.hbm [shape: bf16[512,512], index: 3, kind: input, shape index: {}]   ;;  %s3083_s4 = inlined_call_operand.vmem [shape: f32[1,512], index: 4, kind: input, shape index: {}]   ;;  %s3084_s5 = inlined_call_operand.hbm [shape: bf16[512,256], index: 5, kind: input, shape index: {}]   ;;  %s3085_s6 = inlined_call_operand.vmem [shape: f32[1,256], index: 6, kind: input, shape index: {}]   ;;  %s3086_s7 = inlined_call_operand.hbm [shape: bf16[256,128], index: 7, kind: input, shape index: {}]   ;;  %s3087_s8 = inlined_call_operand.vmem [shape: f32[1,128], index: 8, kind: input, shape index: {}]   ;;  %s3088_s9 = inlined_call_operand.hbm [shape: f32[8,128], index: 9, kind: output, shape index: {}]  }
   0x1   :  { %15 = vsyncpa [#allocation6], 0 }
   0x2   :  { %16 = vsyncpa [#allocation9], 0 }
   0x3   :  { %17 = vsyncpa [#allocation4], 0  ;;  %s2879_s30 = smov [#allocation5]   ;;  %s2880_s11 = smov [#allocation2]  }
   0x4   :  { %s39_s10 = sshll.u32 %s2879_s30, 4  ;;  %s25_s12 = sshll.u32 %s2880_s11, 4  ;;  %s40_s10 = int_to_ptr.vmem [resolvable:$true] %s39_s10  ;;  %s2941_s12 = int_to_ptr.vmem [resolvable:$true] %s25_s12 }
   0x5   :  { %s2761_s15 = scalar_lea.hbm %s3082_s3, 16384 }
   0x6   :  { %p2762_p0 = scmp.ne.s32.totalorder %s3082_s3, %s2761_s15  ;;  %p2765_p1 = scmp.lt.u32.totalorder %s2761_s15, %s3082_s3 }
   0x8   :  { %p2767_p2 = pnand %p2765_p1, %p2762_p0 }
   0xa   :  { %2770 = shalt.err (!%p2767_p2)
}
   0xb   :  { %s2771_s20 = scalar_lea.vmem %s40_s10, 16384  ;;  %p2776_p4 = scmp.lt.s32.totalorder %s40_s10, %s40_s10 }
   0xc   :  { %p2772_p3 = scmp.ne.s32.totalorder %s40_s10, %s2771_s20  ;;  %p2777_p5 = scmp.lt.s32.totalorder %s2771_s20, %s2771_s20 }
   0xe   :  { %p2778_p6 = por %p2777_p5, %p2776_p4 }
  0x10   :  { %p2779_p7 = pnand %p2778_p6, %p2772_p3 }
  0x12   :  { %2782 = shalt.err (!%p2779_p7)
}
  0x13   :  { %s2881_s21 = smov 256   ;;  %s2882_s22 = smov 16  }
  0x14   :  { %45 = dma.hbm_to_vmem [thread:$0]  %s3082_s3, 16384, %s40_s10, [#allocation6], %s2881_s21, %s2881_s21, %s2882_s22  }
  0x15   :  { %s2783_s27 = scalar_lea.hbm %s3080_s1, 4096 }
  0x16   :  { %p2784_p8 = scmp.ne.s32.totalorder %s3080_s1, %s2783_s27  ;;  %p2787_p9 = scmp.lt.u32.totalorder %s2783_s27, %s3080_s1 }
  0x18   :  { %p2789_p10 = pnand %p2787_p9, %p2784_p8 }
  0x1a   :  { %2792 = shalt.err (!%p2789_p10)
}
  0x1b   :  { %s2793_s13 = scalar_lea.vmem %s2941_s12, 4096  ;;  %p2798_p12 = scmp.lt.s32.totalorder %s2941_s12, %s2941_s12 }
  0x1c   :  { %p2794_p11 = scmp.ne.s32.totalorder %s2941_s12, %s2793_s13  ;;  %p2799_p13 = scmp.lt.s32.totalorder %s2793_s13, %s2793_s13 }
  0x1e   :  { %p2800_p0 = por %p2799_p13, %p2798_p12 }
  0x20   :  { %p2801_p1 = pnand %p2800_p0, %p2794_p11 }
  0x22   :  { %2804 = shalt.err (!%p2801_p1)
}
  0x23   :  { %31 = dma.hbm_to_vmem [thread:$0]  %s3080_s1, 4096, %s2941_s12, [#allocation3], %s2881_s21, %s2881_s21, %s2882_s22  }
  0x24   :  { %s2883_s14 = smov [#allocation7]   ;;  %s2805_s18 = scalar_lea.hbm %s3084_s5, 8192 }
  0x25   :  { %s53_s15 = sshll.u32 %s2883_s14, 4  ;;  %p2806_p2 = scmp.ne.s32.totalorder %s3084_s5, %s2805_s18  ;;  %s54_s15 = int_to_ptr.vmem [resolvable:$true] %s53_s15 }
  0x26   :  { %p2809_p3 = scmp.lt.u32.totalorder %s2805_s18, %s3084_s5 }
  0x28   :  { %p2811_p4 = pnand %p2809_p3, %p2806_p2 }
  0x2a   :  { %2814 = shalt.err (!%p2811_p4)
}
  0x2b   :  { %s2815_s25 = scalar_lea.vmem %s54_s15, 8192  ;;  %p2820_p6 = scmp.lt.s32.totalorder %s54_s15, %s54_s15 }
  0x2c   :  { %p2816_p5 = scmp.ne.s32.totalorder %s54_s15, %s2815_s25  ;;  %p2821_p7 = scmp.lt.s32.totalorder %s2815_s25, %s2815_s25 }
  0x2e   :  { %p2822_p8 = por %p2821_p7, %p2820_p6 }
  0x30   :  { %p2823_p9 = pnand %p2822_p8, %p2816_p5 }
  0x32   :  { %2826 = shalt.err (!%p2823_p9)
}
  0x33   :  { %s2884_s1 = smov 128   ;;  %s2885_s12 = smov 8  }
  0x34   :  { %59 = dma.hbm_to_vmem [thread:$0]  %s3084_s5, 8192, %s54_s15, [#allocation6], %s2884_s1, %s2884_s1, %s2885_s12  }
  0x35   :  { %s2886_s26 = smov [#allocation8]   ;;  %s2827_s30 = scalar_lea.hbm %s3086_s7, 2048 }
  0x36   :  { %s67_s27 = sshll.u32 %s2886_s26, 4  ;;  %p2828_p10 = scmp.ne.s32.totalorder %s3086_s7, %s2827_s30  ;;  %s68_s27 = int_to_ptr.vmem [resolvable:$true] %s67_s27 }
  0x37   :  { %p2831_p11 = scmp.lt.u32.totalorder %s2827_s30, %s3086_s7 }
  0x39   :  { %p2833_p12 = pnand %p2831_p11, %p2828_p10 }
  0x3b   :  { %2836 = shalt.err (!%p2833_p12)
}
  0x3c   :  { %s2837_s14 = scalar_lea.vmem %s68_s27, 2048  ;;  %p2842_p0 = scmp.lt.s32.totalorder %s68_s27, %s68_s27 }
  0x3d   :  { %p2838_p13 = scmp.ne.s32.totalorder %s68_s27, %s2837_s14  ;;  %p2843_p1 = scmp.lt.s32.totalorder %s2837_s14, %s2837_s14 }
  0x3f   :  { %p2844_p2 = por %p2843_p1, %p2842_p0 }
  0x41   :  { %p2845_p3 = pnand %p2844_p2, %p2838_p13 }
  0x43   :  { %2848 = shalt.err (!%p2845_p3)
}
  0x44   :  { %s2887_s5 = smov 64   ;;  %s2888_s15 = smov 4  }
  0x45   :  { %73 = dma.hbm_to_vmem [thread:$0]  %s3086_s7, 2048, %s68_s27, [#allocation9], %s2887_s5, %s2887_s5, %s2888_s15  }
  0x46   :  { %2871 = dma.done.wait [#allocation3], 4096  }
  0x47   :  { %2872 = vsyncadd [#allocation3], 4294963200 }
  0x48   :  { %2873 = dma.done.wait [#allocation6], 24576  }
  0x49   :  { %2874 = vsyncadd [#allocation6], 4294942720 }
  0x4a   :  { %2875 = dma.done.wait [#allocation9], 2048  }
  0x4b   :  { %2876 = vsyncadd [#allocation9], 4294965248  ;;  %v2889_v0 = vmov 0   ;;  %v2409_v1 = vld [vmem:[#allocation2 + $0x4] ss:$16 sps:$4 sm:$0xff]   ;;  %s2890_s25 = smov [#allocation10]  }
  0x4c   :  { %315 = vmatprep.mubr.bf16.mxu1 %v2889_v0  ;;  %v2411_v2 = vld [vmem:[#allocation2] ss:$16 sps:$4 sm:$0xff]   ;;  %283 = vmatprep.subr.bf16.mxu1 %v2409_v1  ;;  %v2412_v3 = vld [vmem:[#allocation2 + $0x24] ss:$16 sps:$4 sm:$0xff]   ;;  %v2435_v23 = vld [vmem:[#allocation2 + $0xc] ss:$16 sps:$4 sm:$0xff]  }
  0x4d   :  { %284 = vmatpush1.bf16.msra.mxu1 %v2411_v2  ;;  %v2414_v4 = vld [vmem:[#allocation2 + $0x20] ss:$16 sps:$4 sm:$0xff]   ;;  %v2415_v5 = vld [vmem:[#allocation2 + $0x44] ss:$16 sps:$4 sm:$0xff]   ;;  %v2433_v26 = vld [vmem:[#allocation2 + $0x8] ss:$16 sps:$4 sm:$0xff]  }
  0x4e   :  { %285 = vmatprep.subr.bf16.mxu1 %v2412_v3  ;;  %v2417_v6 = vld [vmem:[#allocation2 + $0x40] ss:$16 sps:$4 sm:$0xff]   ;;  %v2418_v7 = vld [vmem:[#allocation2 + $0x64] ss:$16 sps:$4 sm:$0xff]   ;;  %v2438_v27 = vld [vmem:[#allocation2 + $0x2c] ss:$16 sps:$4 sm:$0xff]  }
  0x4f   :  { %v2420_v8 = vld [vmem:[#allocation2 + $0x60] ss:$16 sps:$4 sm:$0xff]   ;;  %v2421_v9 = vld [vmem:[#allocation2 + $0x84] ss:$16 sps:$4 sm:$0xff]   ;;  %v2436_v29 = vld [vmem:[#allocation2 + $0x28] ss:$16 sps:$4 sm:$0xff]  }
  0x50   :  { %v2423_v10 = vld [vmem:[#allocation2 + $0x80] ss:$16 sps:$4 sm:$0xff]   ;;  %v2424_v11 = vld [vmem:[#allocation2 + $0xa4] ss:$16 sps:$4 sm:$0xff]   ;;  %v2441_v32 = vld [vmem:[#allocation2 + $0x4c] ss:$16 sps:$4 sm:$0xff]  }
  0x51   :  { %286 = vmatpush1.bf16.msra.mxu1 %v2414_v4  ;;  %v2426_v12 = vld [vmem:[#allocation2 + $0xa0] ss:$16 sps:$4 sm:$0xff]   ;;  %v2427_v13 = vld [vmem:[#allocation2 + $0xc4] ss:$16 sps:$4 sm:$0xff]   ;;  %v2439_v34 = vld [vmem:[#allocation2 + $0x48] ss:$16 sps:$4 sm:$0xff]  }
  0x52   :  { %287 = vmatprep.subr.bf16.mxu1 %v2415_v5  ;;  %v2457_v14 = vld [vmem:[#allocation5 + $0x4] ss:$16 sps:$4 sm:$0xff]   ;;  %v2429_v15 = vld [vmem:[#allocation2 + $0xc0] ss:$16 sps:$4 sm:$0xff]   ;;  %v2444_v36 = vld [vmem:[#allocation2 + $0x6c] ss:$16 sps:$4 sm:$0xff]  }
  0x53   :  { %v2430_v16 = vld [vmem:[#allocation2 + $0xe4] ss:$16 sps:$4 sm:$0xff]   ;;  %1199 = vmatprep.subr.bf16.mxu0 %v2457_v14  ;;  %v2462_v17 = vld [vmem:[#allocation5] ss:$16 sps:$4 sm:$0xff]   ;;  %v2442_v37 = vld [vmem:[#allocation2 + $0x68] ss:$16 sps:$4 sm:$0xff]  }
  0x54   :  { %v2463_v18 = vld [vmem:[#allocation5 + $0x24] ss:$16 sps:$4 sm:$0xff]   ;;  %v2432_v19 = vld [vmem:[#allocation2 + $0xe0] ss:$16 sps:$4 sm:$0xff]   ;;  %1200 = vmatpush1.bf16.msra.mxu0 %v2462_v17  ;;  %v2447_v40 = vld [vmem:[#allocation2 + $0x8c] ss:$16 sps:$4 sm:$0xff]  }
  0x55   :  { %288 = vmatpush1.bf16.msra.mxu1 %v2417_v6  ;;  %v89_v20 = vld [vmem:[%s3079_s0] sm:$0xff]  ;;  %1201 = vmatprep.subr.bf16.mxu0 %v2463_v18  ;;  %v2445_v42 = vld [vmem:[#allocation2 + $0x88] ss:$16 sps:$4 sm:$0xff]   ;;  %v2450_v44 = vld [vmem:[#allocation2 + $0xac] ss:$16 sps:$4 sm:$0xff]   ;;  %s2111_s1 = sshll.u32 %s2890_s25, 4  ;;  %s2112_s1 = int_to_ptr.vmem [resolvable:$true] %s2111_s1 }
  0x56   :  { %289 = vmatprep.subr.bf16.mxu1 %v2418_v7  ;;  %v2468_v21 = vld [vmem:[#allocation5 + $0x20] ss:$16 sps:$4 sm:$0xff]   ;;  %v2469_v22 = vld [vmem:[#allocation5 + $0x44] ss:$16 sps:$4 sm:$0xff]   ;;  %v3000_v24 = vpack.c.bf16 %v89_v20, %v89_v20  ;;  %v2448_v45 = vld [vmem:[#allocation2 + $0xa8] ss:$16 sps:$4 sm:$0xff]   ;;  %p2854_p5 = scmp.lt.s32.totalorder %s2112_s1, %s2112_s1 }
  0x57   :  { %v2474_v25 = vld [vmem:[#allocation5 + $0x40] ss:$16 sps:$4 sm:$0xff]   ;;  %v2475_v28 = vld [vmem:[#allocation5 + $0x64] ss:$16 sps:$4 sm:$0xff]   ;;  %v2453_v48 = vld [vmem:[#allocation2 + $0xcc] ss:$16 sps:$4 sm:$0xff]  }
  0x58   :  { %1202 = vmatpush1.bf16.msra.mxu0 %v2468_v21  ;;  %v2480_v30 = vld [vmem:[#allocation5 + $0x60] ss:$16 sps:$4 sm:$0xff]   ;;  %v2481_v31 = vld [vmem:[#allocation5 + $0x84] ss:$16 sps:$4 sm:$0xff]   ;;  %v2451_v50 = vld [vmem:[#allocation2 + $0xc8] ss:$16 sps:$4 sm:$0xff]  }
  0x59   :  { %290 = vmatpush1.bf16.msra.mxu1 %v2420_v8  ;;  %1203 = vmatprep.subr.bf16.mxu0 %v2469_v22  ;;  %v2486_v33 = vld [vmem:[#allocation5 + $0x80] ss:$16 sps:$4 sm:$0xff]   ;;  %v2487_v35 = vld [vmem:[#allocation5 + $0xa4] ss:$16 sps:$4 sm:$0xff]   ;;  %v2456_v52 = vld [vmem:[#allocation2 + $0xec] ss:$16 sps:$4 sm:$0xff]  }
  0x5a   :  { %291 = vmatprep.subr.bf16.mxu1 %v2421_v9  ;;  %v2492_v38 = vld [vmem:[#allocation5 + $0xa0] ss:$16 sps:$4 sm:$0xff]   ;;  %v2493_v39 = vld [vmem:[#allocation5 + $0xc4] ss:$16 sps:$4 sm:$0xff]   ;;  %v2454_v53 = vld [vmem:[#allocation2 + $0xe8] ss:$16 sps:$4 sm:$0xff]  }
  0x5b   :  { %v2498_v41 = vld [vmem:[#allocation5 + $0xc0] ss:$16 sps:$4 sm:$0xff]   ;;  %v2499_v43 = vld [vmem:[#allocation5 + $0xe4] ss:$16 sps:$4 sm:$0xff]   ;;  %v2461_v54 = vld [vmem:[#allocation5 + $0xc] ss:$16 sps:$4 sm:$0xff]  }
  0x5c   :  { %1204 = vmatpush1.bf16.msra.mxu0 %v2474_v25  ;;  %v2504_v46 = vld [vmem:[#allocation5 + $0xe0] ss:$16 sps:$4 sm:$0xff]   ;;  %v2505_v47 = vld [vmem:[#allocation5 + $0x104] ss:$16 sps:$4 sm:$0xff]   ;;  %v2459_v58 = vld [vmem:[#allocation5 + $0x8] ss:$16 sps:$4 sm:$0xff]  }
  0x5d   :  { %292 = vmatpush1.bf16.msra.mxu1 %v2423_v10  ;;  %1205 = vmatprep.subr.bf16.mxu0 %v2475_v28  ;;  %v2510_v49 = vld [vmem:[#allocation5 + $0x100] ss:$16 sps:$4 sm:$0xff]   ;;  %v2511_v51 = vld [vmem:[#allocation5 + $0x124] ss:$16 sps:$4 sm:$0xff]   ;;  %v2467_v60 = vld [vmem:[#allocation5 + $0x2c] ss:$16 sps:$4 sm:$0xff]  }
  0x5e   :  { %293 = vmatprep.subr.bf16.mxu1 %v2424_v11  ;;  %v2516_v55 = vld [vmem:[#allocation5 + $0x120] ss:$16 sps:$4 sm:$0xff]   ;;  %v2517_v56 = vld [vmem:[#allocation5 + $0x144] ss:$16 sps:$4 sm:$0xff]   ;;  %v2465_v62 = vld [vmem:[#allocation5 + $0x28] ss:$16 sps:$4 sm:$0xff]  }
  0x5f   :  { %v2522_v57 = vld [vmem:[#allocation5 + $0x140] ss:$16 sps:$4 sm:$0xff]   ;;  %v2523_v59 = vld [vmem:[#allocation5 + $0x164] ss:$16 sps:$4 sm:$0xff]   ;;  %v2473_v1 = vld [vmem:[#allocation5 + $0x4c] ss:$16 sps:$4 sm:$0xff]  }
  0x60   :  { %1206 = vmatpush1.bf16.msra.mxu0 %v2480_v30  ;;  %v2528_v61 = vld [vmem:[#allocation5 + $0x160] ss:$16 sps:$4 sm:$0xff]   ;;  %v2529_v63 = vld [vmem:[#allocation5 + $0x184] ss:$16 sps:$4 sm:$0xff]   ;;  %v2471_v3 = vld [vmem:[#allocation5 + $0x48] ss:$16 sps:$4 sm:$0xff]  }
  0x61   :  { %294 = vmatpush1.bf16.msra.mxu1 %v2426_v12  ;;  %1207 = vmatprep.subr.bf16.mxu0 %v2481_v31  ;;  %v2534_v2 = vld [vmem:[#allocation5 + $0x180] ss:$16 sps:$4 sm:$0xff]   ;;  %v2535_v4 = vld [vmem:[#allocation5 + $0x1a4] ss:$16 sps:$4 sm:$0xff]   ;;  %v2479_v5 = vld [vmem:[#allocation5 + $0x6c] ss:$16 sps:$4 sm:$0xff]  }
  0x62   :  { %295 = vmatprep.subr.bf16.mxu1 %v2427_v13  ;;  %v2540_v6 = vld [vmem:[#allocation5 + $0x1a0] ss:$16 sps:$4 sm:$0xff]   ;;  %v2477_v7 = vld [vmem:[#allocation5 + $0x68] ss:$16 sps:$4 sm:$0xff]   ;;  %v2485_v8 = vld [vmem:[#allocation5 + $0x8c] ss:$16 sps:$4 sm:$0xff]  }
  0x63   :  { %v2483_v9 = vld [vmem:[#allocation5 + $0x88] ss:$16 sps:$4 sm:$0xff]   ;;  %v2491_v10 = vld [vmem:[#allocation5 + $0xac] ss:$16 sps:$4 sm:$0xff]   ;;  %v2541_v28 = vld [vmem:[#allocation5 + $0x1c4] ss:$16 sps:$4 sm:$0xff]  }
  0x64   :  { %1208 = vmatpush1.bf16.msra.mxu0 %v2486_v33  ;;  %v2489_v11 = vld [vmem:[#allocation5 + $0xa8] ss:$16 sps:$4 sm:$0xff]   ;;  %v2497_v12 = vld [vmem:[#allocation5 + $0xcc] ss:$16 sps:$4 sm:$0xff]   ;;  %v2546_v30 = vld [vmem:[#allocation5 + $0x1c0] ss:$16 sps:$4 sm:$0xff]  }
  0x65   :  { %296 = vmatpush1.bf16.msra.mxu1 %v2429_v15  ;;  %1209 = vmatprep.subr.bf16.mxu0 %v2487_v35  ;;  %v2495_v13 = vld [vmem:[#allocation5 + $0xc8] ss:$16 sps:$4 sm:$0xff]   ;;  %v2503_v14 = vld [vmem:[#allocation5 + $0xec] ss:$16 sps:$4 sm:$0xff]   ;;  %s2849_s12 = scalar_lea.vmem %s2112_s1, 128 }
  0x66   :  { %297 = vmatprep.subr.bf16.mxu1 %v2430_v16  ;;  %v2501_v15 = vld [vmem:[#allocation5 + $0xe8] ss:$16 sps:$4 sm:$0xff]   ;;  %v2509_v16 = vld [vmem:[#allocation5 + $0x10c] ss:$16 sps:$4 sm:$0xff]   ;;  %p2850_p4 = scmp.ne.s32.totalorder %s2112_s1, %s2849_s12  ;;  %p2855_p6 = scmp.lt.s32.totalorder %s2849_s12, %s2849_s12 }
  0x67   :  { %v2507_v17 = vld [vmem:[#allocation5 + $0x108] ss:$16 sps:$4 sm:$0xff]   ;;  %v2515_v18 = vld [vmem:[#allocation5 + $0x12c] ss:$16 sps:$4 sm:$0xff]  }
  0x68   :  { %1210 = vmatpush1.bf16.msra.mxu0 %v2492_v38  ;;  %v2521_v20 = vld [vmem:[#allocation5 + $0x14c] ss:$16 sps:$4 sm:$0xff]   ;;  %v2519_v21 = vld [vmem:[#allocation5 + $0x148] ss:$16 sps:$4 sm:$0xff]   ;;  %v371_v38 = vlaneseq  ;;  %p2856_p7 = por %p2855_p6, %p2854_p5 }
  0x69   :  { %298 = vmatpush1.bf16.msra.mxu1 %v2432_v19  ;;  %1211 = vmatprep.subr.bf16.mxu0 %v2493_v39  ;;  %v2513_v19 = vld [vmem:[#allocation5 + $0x128] ss:$16 sps:$4 sm:$0xff]   ;;  %v2527_v22 = vld [vmem:[#allocation5 + $0x16c] ss:$16 sps:$4 sm:$0xff]  }
  0x6a   :  { %324 = vmatprep.subr.bf16.mxu1 %v2435_v23  ;;  %v2525_v23 = vld [vmem:[#allocation5 + $0x168] ss:$16 sps:$4 sm:$0xff]   ;;  %v2551_v33 = vld [vmem:[#allocation5 + $0x1ec] ss:$16 sps:$4 sm:$0xff]   ;;  %v3005_v39 = vshrl.u32 %v371_v38, 7  ;;  %p2857_p8 = pnand %p2856_p7, %p2850_p4 }
  0x6b   :  { %v2531_v25 = vld [vmem:[#allocation5 + $0x188] ss:$16 sps:$4 sm:$0xff]  }
  0x6c   :  { %316 = vmatmul.mubr.bf16.vlgmr.msra.gmra.mrb[0].mxu1 %v3000_v24  ;;  %1212 = vmatpush1.bf16.msra.mxu0 %v2498_v41  ;;  %v2543_v31 = vld [vmem:[#allocation5 + $0x1c8] ss:$16 sps:$4 sm:$0xff]   ;;  %v369_v41 = vld [vmem:[%s3081_s2] sm:$0xf] }
  0x6d   :  { %325 = vmatpush1.bf16.msra.mxu1 %v2433_v26  ;;  %356 = vmatprep.mubr.bf16.mxu1 %v2889_v0  ;;  %v2539_v26 = vld [vmem:[#allocation5 + $0x1ac] ss:$16 sps:$4 sm:$0xff]   ;;  %v2549_v35 = vld [vmem:[#allocation5 + $0x1e8] ss:$16 sps:$4 sm:$0xff]  }
  0x6e   :  { %326 = vmatprep.subr.bf16.mxu1 %v2438_v27  ;;  %1213 = vmatprep.subr.bf16.mxu0 %v2499_v43  ;;  %v2537_v27 = vld [vmem:[#allocation5 + $0x1a8] ss:$16 sps:$4 sm:$0xff]  }
  0x70   :  { %1214 = vmatpush1.bf16.msra.mxu0 %v2504_v46 }
  0x71   :  { %327 = vmatpush1.bf16.msra.mxu1 %v2436_v29  ;;  %1215 = vmatprep.subr.bf16.mxu0 %v2505_v47  ;;  %v2545_v29 = vld [vmem:[#allocation5 + $0x1cc] ss:$16 sps:$4 sm:$0xff]  }
  0x72   :  { %328 = vmatprep.subr.bf16.mxu1 %v2441_v32  ;;  %v2547_v32 = vld [vmem:[#allocation5 + $0x1e4] ss:$16 sps:$4 sm:$0xff]  }
  0x74   :  { %1216 = vmatpush1.bf16.msra.mxu0 %v2510_v49 }
  0x75   :  { %329 = vmatpush1.bf16.msra.mxu1 %v2439_v34  ;;  %1217 = vmatprep.subr.bf16.mxu0 %v2511_v51  ;;  %v2552_v34 = vld [vmem:[#allocation5 + $0x1e0] ss:$16 sps:$4 sm:$0xff]  }
  0x76   :  { %330 = vmatprep.subr.bf16.mxu1 %v2444_v36  ;;  %v2555_v36 = vld [vmem:[#allocation5 + $0x204] ss:$16 sps:$4 sm:$0xff]  }
  0x78   :  { %1218 = vmatpush1.bf16.msra.mxu0 %v2516_v55 }
  0x79   :  { %331 = vmatpush1.bf16.msra.mxu1 %v2442_v37  ;;  %1219 = vmatprep.subr.bf16.mxu0 %v2517_v56  ;;  %v2558_v37 = vld [vmem:[#allocation5 + $0x20c] ss:$16 sps:$4 sm:$0xff]  }
  0x7a   :  { %332 = vmatprep.subr.bf16.mxu1 %v2447_v40  ;;  %v3008_v40 = vsub.s32 0, %v3005_v39 }
  0x7c   :  { %1220 = vmatpush1.bf16.msra.mxu0 %v2522_v57  ;;  %v374_v43 = vrot.slane %v369_v41, %v3008_v40 }
  0x7d   :  { %333 = vmatpush1.bf16.msra.mxu1 %v2445_v42  ;;  %1221 = vmatprep.subr.bf16.mxu0 %v2523_v59  ;;  %v3014_v42 = vsub.s32 1, %v3005_v39 }
  0x7e   :  { %334 = vmatprep.subr.bf16.mxu1 %v2450_v44 }
  0x7f   :  { %v378_v44 = vrot.slane %v369_v41, %v3014_v42 }
  0x80   :  { %1222 = vmatpush1.bf16.msra.mxu0 %v2528_v61  ;;  %v2556_v61 = vld [vmem:[#allocation5 + $0x208] ss:$16 sps:$4 sm:$0xff]  }
  0x81   :  { %335 = vmatpush1.bf16.msra.mxu1 %v2448_v45  ;;  %1223 = vmatprep.subr.bf16.mxu0 %v2529_v63  ;;  %v391_v45 = vpack.c.bf16 %v374_v43, %v374_v43  ;;  %v392_v46 = vpack.c.bf16 %v378_v44, %v378_v44  ;;  %v2561_v63 = vld [vmem:[#allocation5 + $0x224] ss:$16 sps:$4 sm:$0xff]   ;;  %v2598_v43 = vld [vmem:[#allocation5 + $0x2e8] ss:$16 sps:$4 sm:$0xff]  }
  0x82   :  { %336 = vmatprep.subr.bf16.mxu1 %v2453_v48 }
  0x83   :  { %v396_v47 = vpack.i.b16 %v391_v45, %v391_v45  ;;  %v403_v48 = vpack.i.b16 %v392_v46, %v392_v46  ;;  %v2603_v46 = vld [vmem:[#allocation5 + $0x304] ss:$16 sps:$4 sm:$0xff]  }
  0x84   :  { %1224 = vmatpush1.bf16.msra.mxu0 %v2534_v2  ;;  %v2559_v2 = vld [vmem:[#allocation5 + $0x220] ss:$16 sps:$4 sm:$0xff]  }
  0x85   :  { %337 = vmatpush1.bf16.msra.mxu1 %v2451_v50  ;;  %1225 = vmatprep.subr.bf16.mxu0 %v2535_v4  ;;  %v401_v49 = vrot.slane %v396_v47, %v3008_v40  ;;  %v408_v51 = vrot.slane %v403_v48, %v3008_v40  ;;  %v2567_v4 = vld [vmem:[#allocation5 + $0x244] ss:$16 sps:$4 sm:$0xff]   ;;  %v2606_v47 = vld [vmem:[#allocation5 + $0x30c] ss:$16 sps:$4 sm:$0xff]  }
  0x86   :  { %338 = vmatprep.subr.bf16.mxu1 %v2456_v52 }
  0x88   :  { %1226 = vmatpush1.bf16.msra.mxu0 %v2540_v6  ;;  %v2565_v6 = vld [vmem:[#allocation5 + $0x240] ss:$16 sps:$4 sm:$0xff]  }
  0x89   :  { %339 = vmatpush1.bf16.msra.mxu1 %v2454_v53  ;;  %1227 = vmatprep.subr.bf16.mxu0 %v2541_v28 }
  0x8a   :  { %1281 = vmatprep.subr.bf16.mxu1 %v2461_v54 }
  0x8c   :  { %357 = vmatmul.mubr.bf16.vlgmr.msra.gmra.mrb[4].mxu1 %v3000_v24  ;;  %v2533_v24 = vld [vmem:[#allocation5 + $0x18c] ss:$16 sps:$4 sm:$0xff]   ;;  %1228 = vmatpush1.bf16.msra.mxu0 %v2546_v30  ;;  %v2589_v30 = vld [vmem:[#allocation5 + $0x2c0] ss:$16 sps:$4 sm:$0xff]  }
  0x8d   :  { %1282 = vmatpush1.bf16.msra.mxu1 %v2459_v58  ;;  %1229 = vmatprep.subr.bf16.mxu0 %v2547_v32  ;;  %v2597_v32 = vld [vmem:[#allocation5 + $0x2e4] ss:$16 sps:$4 sm:$0xff]  }
  0x8e   :  { %1283 = vmatprep.subr.bf16.mxu1 %v2467_v60  ;;  %v2553_v60 = vld [vmem:[#allocation5 + $0x200] ss:$16 sps:$4 sm:$0xff]  }
  0x90   :  { %1230 = vmatpush1.bf16.msra.mxu0 %v2552_v34 }
  0x91   :  { %1284 = vmatpush1.bf16.msra.mxu1 %v2465_v62  ;;  %1240 = vmatprep.subr.bf16.mxu0 %v2555_v36 }
  0x92   :  { %1285 = vmatprep.subr.bf16.mxu1 %v2473_v1  ;;  %v2564_v1 = vld [vmem:[#allocation5 + $0x22c] ss:$16 sps:$4 sm:$0xff]  }
  0x95   :  { %1286 = vmatpush1.bf16.msra.mxu1 %v2471_v3  ;;  %v2562_v3 = vld [vmem:[#allocation5 + $0x228] ss:$16 sps:$4 sm:$0xff]  }
  0x96   :  { %1287 = vmatprep.subr.bf16.mxu1 %v2479_v5  ;;  %v2570_v5 = vld [vmem:[#allocation5 + $0x24c] ss:$16 sps:$4 sm:$0xff]  }
  0x99   :  { %1288 = vmatpush1.bf16.msra.mxu1 %v2477_v7  ;;  %v2568_v7 = vld [vmem:[#allocation5 + $0x248] ss:$16 sps:$4 sm:$0xff]  }
  0x9a   :  { %1289 = vmatprep.subr.bf16.mxu1 %v2485_v8  ;;  %v2573_v8 = vld [vmem:[#allocation5 + $0x264] ss:$16 sps:$4 sm:$0xff]  }
  0x9d   :  { %1290 = vmatpush1.bf16.msra.mxu1 %v2483_v9  ;;  %v2576_v9 = vld [vmem:[#allocation5 + $0x26c] ss:$16 sps:$4 sm:$0xff]  }
  0x9e   :  { %1291 = vmatprep.subr.bf16.mxu1 %v2491_v10  ;;  %v381_v10 = vsub.s32 2, %v3005_v39 }
  0xa1   :  { %1292 = vmatpush1.bf16.msra.mxu1 %v2489_v11  ;;  %v385_v11 = vsub.s32 3, %v3005_v39 }
  0xa2   :  { %1293 = vmatprep.subr.bf16.mxu1 %v2497_v12  ;;  %v2571_v12 = vld [vmem:[#allocation5 + $0x260] ss:$16 sps:$4 sm:$0xff]  }
  0xa5   :  { %1294 = vmatpush1.bf16.msra.mxu1 %v2495_v13  ;;  %v2574_v13 = vld [vmem:[#allocation5 + $0x268] ss:$16 sps:$4 sm:$0xff]  }
  0xa6   :  { %1295 = vmatprep.subr.bf16.mxu1 %v2503_v14  ;;  %v2579_v14 = vld [vmem:[#allocation5 + $0x284] ss:$16 sps:$4 sm:$0xff]  }
  0xa9   :  { %1296 = vmatpush1.bf16.msra.mxu1 %v2501_v15  ;;  %v2582_v15 = vld [vmem:[#allocation5 + $0x28c] ss:$16 sps:$4 sm:$0xff]  }
  0xaa   :  { %1297 = vmatprep.subr.bf16.mxu1 %v2509_v16  ;;  %v382_v16 = vrot.slane %v369_v41, %v381_v10 }
  0xad   :  { %1298 = vmatpush1.bf16.msra.mxu1 %v2507_v17  ;;  %v386_v17 = vrot.slane %v369_v41, %v385_v11  ;;  %v2595_v41 = vld [vmem:[#allocation5 + $0x2e0] ss:$16 sps:$4 sm:$0xff]  }
  0xae   :  { %1299 = vmatprep.subr.bf16.mxu1 %v2515_v18  ;;  %v2577_v18 = vld [vmem:[#allocation5 + $0x280] ss:$16 sps:$4 sm:$0xff]  }
  0xb1   :  { %1300 = vmatpush1.bf16.msra.mxu1 %v2513_v19  ;;  %v2580_v19 = vld [vmem:[#allocation5 + $0x288] ss:$16 sps:$4 sm:$0xff]  }
  0xb2   :  { %1301 = vmatprep.subr.bf16.mxu1 %v2521_v20  ;;  %v2585_v20 = vld [vmem:[#allocation5 + $0x2a4] ss:$16 sps:$4 sm:$0xff]  }
  0xb5   :  { %1302 = vmatpush1.bf16.msra.mxu1 %v2519_v21  ;;  %v2588_v21 = vld [vmem:[#allocation5 + $0x2ac] ss:$16 sps:$4 sm:$0xff]  }
  0xb6   :  { %1303 = vmatprep.subr.bf16.mxu1 %v2527_v22  ;;  %v393_v22 = vpack.c.bf16 %v382_v16, %v382_v16  ;;  %v2640_v16 = vld [vmem:[#allocation5 + $0x3c8] ss:$16 sps:$4 sm:$0xff]  }
  0xb8   :  { %v410_v28 = vpack.i.b16 %v393_v22, %v393_v22  ;;  %v2649_v22 = vld [vmem:[#allocation7] ss:$8 sps:$4 sm:$0xff]  }
  0xb9   :  { %1304 = vmatpush1.bf16.msra.mxu1 %v2525_v23  ;;  %v394_v23 = vpack.c.bf16 %v386_v17, %v386_v17  ;;  %v2645_v17 = vld [vmem:[#allocation5 + $0x3e4] ss:$16 sps:$4 sm:$0xff]  }
  0xba   :  { %1305 = vmatprep.subr.bf16.mxu1 %v2533_v24  ;;  %v2583_v24 = vld [vmem:[#allocation5 + $0x2a0] ss:$16 sps:$4 sm:$0xff]   ;;  %v415_v34 = vrot.slane %v410_v28, %v3008_v40  ;;  %v2660_v28 = vld [vmem:[#allocation7 + $0x34] ss:$8 sps:$4 sm:$0xff]  }
  0xbd   :  { %1306 = vmatpush1.bf16.msra.mxu1 %v2531_v25  ;;  %v2586_v25 = vld [vmem:[#allocation5 + $0x2a8] ss:$16 sps:$4 sm:$0xff]  }
  0xbe   :  { %1307 = vmatprep.subr.bf16.mxu1 %v2539_v26  ;;  %v2591_v26 = vld [vmem:[#allocation5 + $0x2c4] ss:$16 sps:$4 sm:$0xff]  }
  0xc1   :  { %1308 = vmatpush1.bf16.msra.mxu1 %v2537_v27  ;;  %v2594_v27 = vld [vmem:[#allocation5 + $0x2cc] ss:$16 sps:$4 sm:$0xff]  }
  0xc2   :  { %1309 = vmatprep.subr.bf16.mxu1 %v2545_v29  ;;  %v417_v29 = vpack.i.b16 %v394_v23, %v394_v23 }
  0xc4   :  { %v422_v36 = vrot.slane %v417_v29, %v3008_v40  ;;  %v2658_v29 = vld [vmem:[#allocation7 + $0x30] ss:$8 sps:$4 sm:$0xff]  }
  0xc5   :  { %1310 = vmatpush1.bf16.msra.mxu1 %v2543_v31  ;;  %v2592_v31 = vld [vmem:[#allocation5 + $0x2c8] ss:$16 sps:$4 sm:$0xff]  }
  0xc6   :  { %1311 = vmatprep.subr.bf16.mxu1 %v2551_v33  ;;  %v2600_v33 = vld [vmem:[#allocation5 + $0x2ec] ss:$16 sps:$4 sm:$0xff]  }
  0xc9   :  { %1312 = vmatpush1.bf16.msra.mxu1 %v2549_v35 }
  0xca   :  { %1322 = vmatprep.subr.bf16.mxu1 %v2558_v37 }
 0x13f   :  { %v317_v50 = vpop.f32.mrb[0].mxu1 }
 0x140   :  { %v365_v52 = vpack.c.bf16 %v317_v50, %v317_v50  ;;  %v319_v53 = vpop.f32.mrb[1].mxu1 }
 0x141   :  { %v366_v54 = vpack.c.bf16 %v319_v53, %v319_v53  ;;  %v321_v55 = vpop.f32.mrb[2].mxu1 }
 0x142   :  { %v423_v56 = vadd.bf16 %v401_v49, %v365_v52  ;;  %v322_v57 = vpop.f32.mrb[3].mxu1  ;;  %v2604_v52 = vld [vmem:[#allocation5 + $0x308] ss:$16 sps:$4 sm:$0xff]   ;;  %v2612_v55 = vld [vmem:[#allocation5 + $0x32c] ss:$16 sps:$4 sm:$0xff]  }
 0x143   :  { %v424_v58 = vadd.bf16 %v408_v51, %v366_v54  ;;  %v2601_v51 = vld [vmem:[#allocation5 + $0x300] ss:$16 sps:$4 sm:$0xff]   ;;  %v2609_v54 = vld [vmem:[#allocation5 + $0x324] ss:$16 sps:$4 sm:$0xff]   ;;  %v2610_v57 = vld [vmem:[#allocation5 + $0x328] ss:$16 sps:$4 sm:$0xff]  }
 0x144   :  { %v427_v62 = vmax.bf16 %v2889_v0, %v423_v56  ;;  %v2607_v56 = vld [vmem:[#allocation5 + $0x320] ss:$16 sps:$4 sm:$0xff]  }
 0x145   :  { %v428_v59 = vmax.bf16 %v2889_v0, %v424_v58  ;;  %v2615_v58 = vld [vmem:[#allocation5 + $0x344] ss:$16 sps:$4 sm:$0xff]  }
 0x147   :  { %1231 = vmatprep.mubr.bf16.mxu0 %v428_v59  ;;  %1313 = vmatprep.mubr.bf16.mxu1 %v428_v59  ;;  %v2618_v59 = vld [vmem:[#allocation5 + $0x34c] ss:$16 sps:$4 sm:$0xff]  }
 0x148   :  { %1232 = vmatmul.mubr.bf16.vlgmr.msra.gmra.mrb[0].mxu0 %v427_v62  ;;  %1314 = vmatmul.mubr.bf16.vlgmr.msra.gmra.mrb[8].mxu1 %v427_v62  ;;  %v2621_v62 = vld [vmem:[#allocation5 + $0x364] ss:$16 sps:$4 sm:$0xff]  }
 0x149   :  { %1241 = vmatpush1.bf16.msra.mxu0 %v2553_v60  ;;  %1323 = vmatpush1.bf16.msra.mxu1 %v2556_v61  ;;  %v2613_v60 = vld [vmem:[#allocation5 + $0x340] ss:$16 sps:$4 sm:$0xff]   ;;  %v2616_v61 = vld [vmem:[#allocation5 + $0x348] ss:$16 sps:$4 sm:$0xff]  }
 0x14a   :  { %1242 = vmatprep.subr.bf16.mxu0 %v2561_v63  ;;  %1324 = vmatprep.subr.bf16.mxu1 %v2564_v1  ;;  %v2624_v63 = vld [vmem:[#allocation5 + $0x36c] ss:$16 sps:$4 sm:$0xff]   ;;  %v2619_v1 = vld [vmem:[#allocation5 + $0x360] ss:$16 sps:$4 sm:$0xff]  }
 0x14d   :  { %1243 = vmatpush1.bf16.msra.mxu0 %v2559_v2  ;;  %1325 = vmatpush1.bf16.msra.mxu1 %v2562_v3  ;;  %v2622_v2 = vld [vmem:[#allocation5 + $0x368] ss:$16 sps:$4 sm:$0xff]   ;;  %v2627_v3 = vld [vmem:[#allocation5 + $0x384] ss:$16 sps:$4 sm:$0xff]  }
 0x14e   :  { %1244 = vmatprep.subr.bf16.mxu0 %v2567_v4  ;;  %1326 = vmatprep.subr.bf16.mxu1 %v2570_v5  ;;  %v2630_v4 = vld [vmem:[#allocation5 + $0x38c] ss:$16 sps:$4 sm:$0xff]   ;;  %v2625_v5 = vld [vmem:[#allocation5 + $0x380] ss:$16 sps:$4 sm:$0xff]  }
 0x151   :  { %1245 = vmatpush1.bf16.msra.mxu0 %v2565_v6  ;;  %1327 = vmatpush1.bf16.msra.mxu1 %v2568_v7  ;;  %v2628_v6 = vld [vmem:[#allocation5 + $0x388] ss:$16 sps:$4 sm:$0xff]   ;;  %v2633_v7 = vld [vmem:[#allocation5 + $0x3a4] ss:$16 sps:$4 sm:$0xff]  }
 0x152   :  { %1246 = vmatprep.subr.bf16.mxu0 %v2573_v8  ;;  %1328 = vmatprep.subr.bf16.mxu1 %v2576_v9  ;;  %v2636_v8 = vld [vmem:[#allocation5 + $0x3ac] ss:$16 sps:$4 sm:$0xff]   ;;  %v2631_v9 = vld [vmem:[#allocation5 + $0x3a0] ss:$16 sps:$4 sm:$0xff]  }
 0x155   :  { %1247 = vmatpush1.bf16.msra.mxu0 %v2571_v12  ;;  %1329 = vmatpush1.bf16.msra.mxu1 %v2574_v13  ;;  %v2634_v12 = vld [vmem:[#allocation5 + $0x3a8] ss:$16 sps:$4 sm:$0xff]   ;;  %v2639_v13 = vld [vmem:[#allocation5 + $0x3c4] ss:$16 sps:$4 sm:$0xff]  }
 0x156   :  { %1248 = vmatprep.subr.bf16.mxu0 %v2579_v14  ;;  %1330 = vmatprep.subr.bf16.mxu1 %v2582_v15  ;;  %v2642_v14 = vld [vmem:[#allocation5 + $0x3cc] ss:$16 sps:$4 sm:$0xff]   ;;  %v2637_v15 = vld [vmem:[#allocation5 + $0x3c0] ss:$16 sps:$4 sm:$0xff]  }
 0x159   :  { %1249 = vmatpush1.bf16.msra.mxu0 %v2577_v18  ;;  %1331 = vmatpush1.bf16.msra.mxu1 %v2580_v19  ;;  %v2648_v18 = vld [vmem:[#allocation5 + $0x3ec] ss:$16 sps:$4 sm:$0xff]   ;;  %v2643_v19 = vld [vmem:[#allocation5 + $0x3e0] ss:$16 sps:$4 sm:$0xff]  }
 0x15a   :  { %1250 = vmatprep.subr.bf16.mxu0 %v2585_v20  ;;  %1332 = vmatprep.subr.bf16.mxu1 %v2588_v21  ;;  %v2646_v20 = vld [vmem:[#allocation5 + $0x3e8] ss:$16 sps:$4 sm:$0xff]   ;;  %v2651_v21 = vld [vmem:[#allocation7 + $0x4] ss:$8 sps:$4 sm:$0xff]  }
 0x15d   :  { %1251 = vmatpush1.bf16.msra.mxu0 %v2583_v24  ;;  %1333 = vmatpush1.bf16.msra.mxu1 %v2586_v25  ;;  %v2654_v24 = vld [vmem:[#allocation7 + $0x14] ss:$8 sps:$4 sm:$0xff]   ;;  %v2652_v25 = vld [vmem:[#allocation7 + $0x10] ss:$8 sps:$4 sm:$0xff]  }
 0x15e   :  { %1252 = vmatprep.subr.bf16.mxu0 %v2591_v26  ;;  %1334 = vmatprep.subr.bf16.mxu1 %v2594_v27  ;;  %v2657_v26 = vld [vmem:[#allocation7 + $0x24] ss:$8 sps:$4 sm:$0xff]   ;;  %v2655_v27 = vld [vmem:[#allocation7 + $0x20] ss:$8 sps:$4 sm:$0xff]  }
 0x15f   :  { %v358_v35 = vpop.f32.mrb[4].mxu1 }
 0x160   :  { %v367_v37 = vpack.c.bf16 %v358_v35, %v358_v35  ;;  %v360_v38 = vpop.f32.mrb[5].mxu1  ;;  %v2667_v35 = vld [vmem:[#allocation7 + $0x60] ss:$8 sps:$4 sm:$0xff]  }
 0x161   :  { %1253 = vmatpush1.bf16.msra.mxu0 %v2589_v30  ;;  %1335 = vmatpush1.bf16.msra.mxu1 %v2592_v31  ;;  %v368_v44 = vpack.c.bf16 %v360_v38, %v360_v38  ;;  %v362_v45 = vpop.f32.mrb[6].mxu1  ;;  %v2663_v30 = vld [vmem:[#allocation7 + $0x44] ss:$8 sps:$4 sm:$0xff]   ;;  %v2661_v31 = vld [vmem:[#allocation7 + $0x40] ss:$8 sps:$4 sm:$0xff]  }
 0x162   :  { %1254 = vmatprep.subr.bf16.mxu0 %v2597_v32  ;;  %1336 = vmatprep.subr.bf16.mxu1 %v2600_v33  ;;  %v3030_v48 = vadd.bf16 %v415_v34, %v367_v37  ;;  %v363_v49 = vpop.f32.mrb[7].mxu1  ;;  %v2666_v32 = vld [vmem:[#allocation7 + $0x54] ss:$8 sps:$4 sm:$0xff]   ;;  %v2664_v33 = vld [vmem:[#allocation7 + $0x50] ss:$8 sps:$4 sm:$0xff]  }
 0x163   :  { %v426_v50 = vadd.bf16 %v422_v36, %v368_v44  ;;  %v2669_v34 = vld [vmem:[#allocation7 + $0x64] ss:$8 sps:$4 sm:$0xff]   ;;  %v2672_v36 = vld [vmem:[#allocation7 + $0x74] ss:$8 sps:$4 sm:$0xff]   ;;  %v2670_v37 = vld [vmem:[#allocation7 + $0x70] ss:$8 sps:$4 sm:$0xff]  }
 0x164   :  { %v429_v23 = vmax.bf16 %v2889_v0, %v3030_v48  ;;  %v2675_v38 = vld [vmem:[#allocation7 + $0x84] ss:$8 sps:$4 sm:$0xff]   ;;  %v2676_v44 = vld [vmem:[#allocation7 + $0x90] ss:$8 sps:$4 sm:$0xff]  }
 0x165   :  { %1255 = vmatpush1.bf16.msra.mxu0 %v2595_v41  ;;  %1337 = vmatpush1.bf16.msra.mxu1 %v2598_v43  ;;  %v430_v53 = vmax.bf16 %v2889_v0, %v426_v50  ;;  %v2673_v41 = vld [vmem:[#allocation7 + $0x80] ss:$8 sps:$4 sm:$0xff]   ;;  %v2678_v43 = vld [vmem:[#allocation7 + $0x94] ss:$8 sps:$4 sm:$0xff]   ;;  %v2681_v45 = vld [vmem:[#allocation7 + $0xa4] ss:$8 sps:$4 sm:$0xff]  }
 0x166   :  { %1256 = vmatprep.subr.bf16.mxu0 %v2603_v46  ;;  %1338 = vmatprep.subr.bf16.mxu1 %v2606_v47  ;;  %v2679_v46 = vld [vmem:[#allocation7 + $0xa0] ss:$8 sps:$4 sm:$0xff]   ;;  %v2684_v47 = vld [vmem:[#allocation7 + $0xb4] ss:$8 sps:$4 sm:$0xff]   ;;  %v2682_v48 = vld [vmem:[#allocation7 + $0xb0] ss:$8 sps:$4 sm:$0xff]  }
 0x167   :  { %1272 = vmatprep.mubr.bf16.mxu0 %v430_v53  ;;  %1354 = vmatprep.mubr.bf16.mxu1 %v430_v53  ;;  %v2687_v49 = vld [vmem:[#allocation7 + $0xc4] ss:$8 sps:$4 sm:$0xff]   ;;  %v2685_v50 = vld [vmem:[#allocation7 + $0xc0] ss:$8 sps:$4 sm:$0xff]  }
 0x168   :  { %v2693_v53 = vld [vmem:[#allocation7 + $0xe4] ss:$8 sps:$4 sm:$0xff]  }
 0x169   :  { %1257 = vmatpush1.bf16.msra.mxu0 %v2601_v51  ;;  %1339 = vmatpush1.bf16.msra.mxu1 %v2604_v52  ;;  %v2690_v51 = vld [vmem:[#allocation7 + $0xd4] ss:$8 sps:$4 sm:$0xff]   ;;  %v2688_v52 = vld [vmem:[#allocation7 + $0xd0] ss:$8 sps:$4 sm:$0xff]  }
 0x16a   :  { %1258 = vmatprep.subr.bf16.mxu0 %v2609_v54  ;;  %1340 = vmatprep.subr.bf16.mxu1 %v2612_v55  ;;  %v2691_v54 = vld [vmem:[#allocation7 + $0xe0] ss:$8 sps:$4 sm:$0xff]   ;;  %v2696_v55 = vld [vmem:[#allocation7 + $0xf4] ss:$8 sps:$4 sm:$0xff]  }
 0x16d   :  { %1259 = vmatpush1.bf16.msra.mxu0 %v2607_v56  ;;  %1341 = vmatpush1.bf16.msra.mxu1 %v2610_v57  ;;  %v2694_v56 = vld [vmem:[#allocation7 + $0xf0] ss:$8 sps:$4 sm:$0xff]   ;;  %v2699_v57 = vld [vmem:[#allocation7 + $0x104] ss:$8 sps:$4 sm:$0xff]  }
 0x16e   :  { %1260 = vmatprep.subr.bf16.mxu0 %v2615_v58  ;;  %1342 = vmatprep.subr.bf16.mxu1 %v2618_v59  ;;  %v2745_v58 = vld [vmem:[#allocation8 + $0x40] sm:$0xff]  }
 0x16f   :  { %v2746_v59 = vld [vmem:[#allocation8] sm:$0xff]  }
 0x171   :  { %1261 = vmatpush1.bf16.msra.mxu0 %v2613_v60  ;;  %1343 = vmatpush1.bf16.msra.mxu1 %v2616_v61  ;;  %v2747_v60 = vld [vmem:[#allocation8 + $0x48] sm:$0xff]  }
 0x172   :  { %1262 = vmatprep.subr.bf16.mxu0 %v2621_v62  ;;  %1344 = vmatprep.subr.bf16.mxu1 %v2624_v63  ;;  %v2748_v61 = vld [vmem:[#allocation8 + $0x8] sm:$0xff]   ;;  %v2749_v62 = vld [vmem:[#allocation8 + $0x50] sm:$0xff]  }
 0x173   :  { %v2750_v63 = vld [vmem:[#allocation8 + $0x10] sm:$0xff]  }
 0x175   :  { %1263 = vmatpush1.bf16.msra.mxu0 %v2619_v1  ;;  %1345 = vmatpush1.bf16.msra.mxu1 %v2622_v2  ;;  %v2751_v1 = vld [vmem:[#allocation8 + $0x58] sm:$0xff]  }
 0x176   :  { %1264 = vmatprep.subr.bf16.mxu0 %v2627_v3  ;;  %1346 = vmatprep.subr.bf16.mxu1 %v2630_v4  ;;  %v2752_v2 = vld [vmem:[#allocation8 + $0x18] sm:$0xff]   ;;  %v2753_v3 = vld [vmem:[#allocation8 + $0x60] sm:$0xff]  }
 0x177   :  { %v2754_v4 = vld [vmem:[#allocation8 + $0x20] sm:$0xff]  }
 0x179   :  { %1265 = vmatpush1.bf16.msra.mxu0 %v2625_v5  ;;  %1347 = vmatpush1.bf16.msra.mxu1 %v2628_v6  ;;  %v2755_v5 = vld [vmem:[#allocation8 + $0x68] sm:$0xff]  }
 0x17a   :  { %1266 = vmatprep.subr.bf16.mxu0 %v2633_v7  ;;  %1348 = vmatprep.subr.bf16.mxu1 %v2636_v8  ;;  %v2756_v6 = vld [vmem:[#allocation8 + $0x28] sm:$0xff]   ;;  %v1367_v7 = vld [vmem:[%s3083_s4] sm:$0xf] }
 0x17b   :  { %v1372_v8 = vrot.slane %v1367_v7, %v3008_v40 }
 0x17d   :  { %1267 = vmatpush1.bf16.msra.mxu0 %v2631_v9  ;;  %1349 = vmatpush1.bf16.msra.mxu1 %v2634_v12  ;;  %v1380_v9 = vrot.slane %v1367_v7, %v381_v10  ;;  %v1376_v12 = vrot.slane %v1367_v7, %v3014_v42 }
 0x17e   :  { %1268 = vmatprep.subr.bf16.mxu0 %v2639_v13  ;;  %1350 = vmatprep.subr.bf16.mxu1 %v2642_v14  ;;  %v1384_v13 = vrot.slane %v1367_v7, %v385_v11  ;;  %v1389_v14 = vpack.c.bf16 %v1372_v8, %v1372_v8  ;;  %v2738_v7 = vld [vmem:[#allocation7 + $0x1d4] ss:$8 sps:$4 sm:$0xff]   ;;  %v2736_v8 = vld [vmem:[#allocation7 + $0x1d0] ss:$8 sps:$4 sm:$0xff]  }
 0x181   :  { %1269 = vmatpush1.bf16.msra.mxu0 %v2637_v15  ;;  %1351 = vmatpush1.bf16.msra.mxu1 %v2640_v16  ;;  %v1391_v15 = vpack.c.bf16 %v1380_v9, %v1380_v9  ;;  %v1390_v16 = vpack.c.bf16 %v1376_v12, %v1376_v12  ;;  %v2741_v9 = vld [vmem:[#allocation7 + $0x1e4] ss:$8 sps:$4 sm:$0xff]   ;;  %v2739_v12 = vld [vmem:[#allocation7 + $0x1e0] ss:$8 sps:$4 sm:$0xff]  }
 0x182   :  { %1270 = vmatprep.subr.bf16.mxu0 %v2645_v17  ;;  %1352 = vmatprep.subr.bf16.mxu1 %v2648_v18  ;;  %v1392_v17 = vpack.c.bf16 %v1384_v13, %v1384_v13  ;;  %v1394_v18 = vpack.i.b16 %v1389_v14, %v1389_v14  ;;  %v2744_v13 = vld [vmem:[#allocation7 + $0x1f4] ss:$8 sps:$4 sm:$0xff]   ;;  %v2742_v14 = vld [vmem:[#allocation7 + $0x1f0] ss:$8 sps:$4 sm:$0xff]  }
 0x185   :  { %1271 = vmatpush1.bf16.msra.mxu0 %v2643_v19  ;;  %1353 = vmatpush1.bf16.msra.mxu1 %v2646_v20  ;;  %v1408_v19 = vpack.i.b16 %v1391_v15, %v1391_v15  ;;  %v1401_v20 = vpack.i.b16 %v1390_v16, %v1390_v16  ;;  %v2757_v16 = vld [vmem:[#allocation8 + $0x70] sm:$0xff]  }
 0x186   :  { %1813 = vmatprep.subr.bf16.mxu0 %v2651_v21  ;;  %2363 = vmatprep.subr.bf16.mxu1 %v2745_v58  ;;  %v1415_v21 = vpack.i.b16 %v1392_v17, %v1392_v17  ;;  %v2720_v58 = vld [vmem:[#allocation7 + $0x174] ss:$8 sps:$4 sm:$0xff]  }
 0x187   :  { %v1406_v10 = vrot.slane %v1401_v20, %v3008_v40  ;;  %v2758_v17 = vld [vmem:[#allocation8 + $0x30] sm:$0xff]   ;;  %v1897_v20 = vld [vmem:[%s3085_s6] sm:$0x3] }
 0x188   :  { %1273 = vmatmul.mubr.bf16.vlgmr.msra.gmra.mrb[0].mxu0 %v429_v23  ;;  %1355 = vmatmul.mubr.bf16.vlgmr.msra.gmra.mrb[8].mxu1 %v429_v23  ;;  %v1413_v23 = vrot.slane %v1408_v19, %v3008_v40  ;;  %v2760_v19 = vld [vmem:[#allocation8 + $0x38] sm:$0xff]  }
 0x189   :  { %1814 = vmatpush1.bf16.msra.mxu0 %v2649_v22  ;;  %2364 = vmatpush3.bf16.msra.mxu1 %v2746_v59  ;;  %v1399_v22 = vrot.slane %v1394_v18, %v3008_v40  ;;  %v2718_v59 = vld [vmem:[#allocation7 + $0x170] ss:$8 sps:$4 sm:$0xff]  }
 0x18a   :  { %1815 = vmatprep.subr.bf16.mxu0 %v2654_v24  ;;  %2365 = vmatprep.subr.bf16.mxu1 %v2747_v60  ;;  %v2723_v60 = vld [vmem:[#allocation7 + $0x184] ss:$8 sps:$4 sm:$0xff]   ;;  %v2759_v18 = vld [vmem:[#allocation8 + $0x78] sm:$0xff]  }
 0x18d   :  { %1816 = vmatpush1.bf16.msra.mxu0 %v2652_v25  ;;  %2366 = vmatpush3.bf16.msra.mxu1 %v2748_v61  ;;  %v2721_v61 = vld [vmem:[#allocation7 + $0x180] ss:$8 sps:$4 sm:$0xff]  }
 0x18e   :  { %1817 = vmatprep.subr.bf16.mxu0 %v2657_v26  ;;  %2367 = vmatprep.subr.bf16.mxu1 %v2749_v62  ;;  %v1420_v26 = vrot.slane %v1415_v21, %v3008_v40  ;;  %v2726_v62 = vld [vmem:[#allocation7 + $0x194] ss:$8 sps:$4 sm:$0xff]   ;;  %v1902_v21 = vrot.slane %v1897_v20, %v3008_v40 }
 0x191   :  { %1818 = vmatpush1.bf16.msra.mxu0 %v2655_v27  ;;  %2368 = vmatpush3.bf16.msra.mxu1 %v2750_v63  ;;  %v2724_v63 = vld [vmem:[#allocation7 + $0x190] ss:$8 sps:$4 sm:$0xff]  }
 0x192   :  { %1819 = vmatprep.subr.bf16.mxu0 %v2660_v28  ;;  %2369 = vmatprep.subr.bf16.mxu1 %v2751_v1  ;;  %v2729_v1 = vld [vmem:[#allocation7 + $0x1a4] ss:$8 sps:$4 sm:$0xff]  }
 0x195   :  { %1820 = vmatpush1.bf16.msra.mxu0 %v2658_v29  ;;  %2370 = vmatpush3.bf16.msra.mxu1 %v2752_v2  ;;  %v2727_v2 = vld [vmem:[#allocation7 + $0x1a0] ss:$8 sps:$4 sm:$0xff]  }
 0x196   :  { %1821 = vmatprep.subr.bf16.mxu0 %v2663_v30  ;;  %2371 = vmatprep.subr.bf16.mxu1 %v2753_v3  ;;  %v2732_v3 = vld [vmem:[#allocation7 + $0x1b4] ss:$8 sps:$4 sm:$0xff]  }
 0x199   :  { %1822 = vmatpush1.bf16.msra.mxu0 %v2661_v31  ;;  %2372 = vmatpush3.bf16.msra.mxu1 %v2754_v4  ;;  %v2730_v4 = vld [vmem:[#allocation7 + $0x1b0] ss:$8 sps:$4 sm:$0xff]  }
 0x19a   :  { %1823 = vmatprep.subr.bf16.mxu0 %v2666_v32  ;;  %2373 = vmatprep.subr.bf16.mxu1 %v2755_v5  ;;  %v2735_v5 = vld [vmem:[#allocation7 + $0x1c4] ss:$8 sps:$4 sm:$0xff]  }
 0x19d   :  { %1824 = vmatpush1.bf16.msra.mxu0 %v2664_v33  ;;  %2374 = vmatpush3.bf16.msra.mxu1 %v2756_v6  ;;  %v2733_v6 = vld [vmem:[#allocation7 + $0x1c0] ss:$8 sps:$4 sm:$0xff]  }
 0x19e   :  { %1825 = vmatprep.subr.bf16.mxu0 %v2669_v34  ;;  %2375 = vmatprep.subr.bf16.mxu1 %v2757_v16 }
 0x1a1   :  { %1826 = vmatpush1.bf16.msra.mxu0 %v2667_v35  ;;  %2376 = vmatpush3.bf16.msra.mxu1 %v2758_v17 }
 0x1a2   :  { %1827 = vmatprep.subr.bf16.mxu0 %v2672_v36  ;;  %2377 = vmatprep.subr.bf16.mxu1 %v2759_v18 }
 0x1a5   :  { %1828 = vmatpush1.bf16.msra.mxu0 %v2670_v37  ;;  %2378 = vmatpush3.bf16.msra.mxu1 %v2760_v19 }
 0x1a6   :  { %1829 = vmatprep.subr.bf16.mxu0 %v2675_v38 }
 0x1a9   :  { %1830 = vmatpush1.bf16.msra.mxu0 %v2673_v41 }
 0x1aa   :  { %1831 = vmatprep.subr.bf16.mxu0 %v2678_v43  ;;  %v2697_v43 = vld [vmem:[#allocation7 + $0x100] ss:$8 sps:$4 sm:$0xff]  }
 0x1ad   :  { %1832 = vmatpush1.bf16.msra.mxu0 %v2676_v44 }
 0x1ae   :  { %1833 = vmatprep.subr.bf16.mxu0 %v2681_v45  ;;  %v2702_v45 = vld [vmem:[#allocation7 + $0x114] ss:$8 sps:$4 sm:$0xff]  }
 0x1b1   :  { %1834 = vmatpush1.bf16.msra.mxu0 %v2679_v46 }
 0x1b2   :  { %1835 = vmatprep.subr.bf16.mxu0 %v2684_v47  ;;  %v2700_v47 = vld [vmem:[#allocation7 + $0x110] ss:$8 sps:$4 sm:$0xff]  }
 0x1b5   :  { %1836 = vmatpush1.bf16.msra.mxu0 %v2682_v48  ;;  %v2705_v48 = vld [vmem:[#allocation7 + $0x124] ss:$8 sps:$4 sm:$0xff]  }
 0x1b6   :  { %1837 = vmatprep.subr.bf16.mxu0 %v2687_v49  ;;  %v2703_v49 = vld [vmem:[#allocation7 + $0x120] ss:$8 sps:$4 sm:$0xff]  }
 0x1b9   :  { %1838 = vmatpush1.bf16.msra.mxu0 %v2685_v50  ;;  %v2708_v50 = vld [vmem:[#allocation7 + $0x134] ss:$8 sps:$4 sm:$0xff]  }
 0x1ba   :  { %1839 = vmatprep.subr.bf16.mxu0 %v2690_v51  ;;  %v2706_v51 = vld [vmem:[#allocation7 + $0x130] ss:$8 sps:$4 sm:$0xff]  }
 0x1bd   :  { %1840 = vmatpush1.bf16.msra.mxu0 %v2688_v52  ;;  %v2711_v52 = vld [vmem:[#allocation7 + $0x144] ss:$8 sps:$4 sm:$0xff]  }
 0x1be   :  { %1841 = vmatprep.subr.bf16.mxu0 %v2693_v53  ;;  %v2709_v53 = vld [vmem:[#allocation7 + $0x140] ss:$8 sps:$4 sm:$0xff]  }
 0x1c1   :  { %1842 = vmatpush1.bf16.msra.mxu0 %v2691_v54  ;;  %v2714_v54 = vld [vmem:[#allocation7 + $0x154] ss:$8 sps:$4 sm:$0xff]  }
 0x1c2   :  { %1843 = vmatprep.subr.bf16.mxu0 %v2696_v55  ;;  %v2712_v55 = vld [vmem:[#allocation7 + $0x150] ss:$8 sps:$4 sm:$0xff]  }
 0x1c5   :  { %1844 = vmatpush1.bf16.msra.mxu0 %v2694_v56  ;;  %v2717_v56 = vld [vmem:[#allocation7 + $0x164] ss:$8 sps:$4 sm:$0xff]  }
 0x1c6   :  { %1854 = vmatprep.subr.bf16.mxu0 %v2699_v57  ;;  %v2715_v57 = vld [vmem:[#allocation7 + $0x160] ss:$8 sps:$4 sm:$0xff]  }
 0x25b   :  { %v1274_v24 = vpop.f32.mrb[0].mxu0  ;;  %v1356_v25 = vpop.f32.mrb[8].mxu1 }
 0x25c   :  { %v1363_v39 = vpack.c.bf16 %v1274_v24, %v1274_v24  ;;  %v1365_v11 = vpack.c.bf16 %v1356_v25, %v1356_v25  ;;  %v1276_v27 = vpop.f32.mrb[1].mxu0  ;;  %v1358_v28 = vpop.f32.mrb[9].mxu1 }
 0x25d   :  { %v1364_v29 = vpack.c.bf16 %v1276_v27, %v1276_v27  ;;  %v1366_v30 = vpack.c.bf16 %v1358_v28, %v1358_v28  ;;  %v1278_v31 = vpop.f32.mrb[2].mxu0  ;;  %v1360_v32 = vpop.f32.mrb[10].mxu1 }
 0x25e   :  { %v1421_v33 = vadd.bf16 %v1399_v22, %v1363_v39  ;;  %v3048_v34 = vadd.bf16 %v1413_v23, %v1365_v11  ;;  %v1279_v35 = vpop.f32.mrb[3].mxu0  ;;  %v1361_v36 = vpop.f32.mrb[11].mxu1  ;;  %v1906_v22 = vrot.slane %v1897_v20, %v3014_v42  ;;  %v1909_v23 = vpack.c.bf16 %v1902_v21, %v1902_v21 }
 0x25f   :  { %v1422_v37 = vadd.bf16 %v1406_v10, %v1364_v29  ;;  %v1424_v38 = vadd.bf16 %v1420_v26, %v1366_v30  ;;  %v2346_v36 = vld [vmem:[%s3087_s8] ss:$0 sm:$0xff] }
 0x260   :  { %v1425_v44 = vmax.bf16 %v2889_v0, %v1421_v33  ;;  %v1427_v15 = vmax.bf16 %v2889_v0, %v3048_v34  ;;  %v1910_v24 = vpack.c.bf16 %v1906_v22, %v1906_v22  ;;  %v1912_v25 = vpack.i.b16 %v1909_v23, %v1909_v23 }
 0x261   :  { %v1426_v41 = vmax.bf16 %v2889_v0, %v1422_v37  ;;  %v1428_v46 = vmax.bf16 %v2889_v0, %v1424_v38 }
 0x262   :  { %v1919_v10 = vpack.i.b16 %v1910_v24, %v1910_v24  ;;  %v1917_v26 = vrot.slane %v1912_v25, %v3008_v40 }
 0x263   :  { %1845 = vmatprep.mubr.bf16.mxu0 %v1426_v41 }
 0x264   :  { %1846 = vmatmul.mubr.bf16.vlgmr.msra.gmra.mrb[4].mxu0 %v1425_v44  ;;  %v1924_v11 = vrot.slane %v1919_v10, %v3008_v40 }
 0x265   :  { %1855 = vmatpush1.bf16.msra.mxu0 %v2697_v43  ;;  %1886 = vmatprep.mubr.bf16.mxu0 %v1428_v46 }
 0x266   :  { %1856 = vmatprep.subr.bf16.mxu0 %v2702_v45 }
 0x269   :  { %1857 = vmatpush1.bf16.msra.mxu0 %v2700_v47 }
 0x26a   :  { %1858 = vmatprep.subr.bf16.mxu0 %v2705_v48 }
 0x26d   :  { %1859 = vmatpush1.bf16.msra.mxu0 %v2703_v49 }
 0x26e   :  { %1860 = vmatprep.subr.bf16.mxu0 %v2708_v50 }
 0x271   :  { %1861 = vmatpush1.bf16.msra.mxu0 %v2706_v51 }
 0x272   :  { %1862 = vmatprep.subr.bf16.mxu0 %v2711_v52 }
 0x275   :  { %1863 = vmatpush1.bf16.msra.mxu0 %v2709_v53 }
 0x276   :  { %1864 = vmatprep.subr.bf16.mxu0 %v2714_v54 }
 0x279   :  { %1865 = vmatpush1.bf16.msra.mxu0 %v2712_v55 }
 0x27a   :  { %1866 = vmatprep.subr.bf16.mxu0 %v2717_v56 }
 0x27d   :  { %1867 = vmatpush1.bf16.msra.mxu0 %v2715_v57 }
 0x27e   :  { %1868 = vmatprep.subr.bf16.mxu0 %v2720_v58 }
 0x281   :  { %1869 = vmatpush1.bf16.msra.mxu0 %v2718_v59 }
 0x282   :  { %1870 = vmatprep.subr.bf16.mxu0 %v2723_v60 }
 0x285   :  { %1871 = vmatpush1.bf16.msra.mxu0 %v2721_v61 }
 0x286   :  { %1872 = vmatprep.subr.bf16.mxu0 %v2726_v62 }
 0x289   :  { %1873 = vmatpush1.bf16.msra.mxu0 %v2724_v63 }
 0x28a   :  { %1874 = vmatprep.subr.bf16.mxu0 %v2729_v1 }
 0x28d   :  { %1875 = vmatpush1.bf16.msra.mxu0 %v2727_v2 }
 0x28e   :  { %1876 = vmatprep.subr.bf16.mxu0 %v2732_v3 }
 0x291   :  { %1877 = vmatpush1.bf16.msra.mxu0 %v2730_v4 }
 0x292   :  { %1878 = vmatprep.subr.bf16.mxu0 %v2735_v5 }
 0x295   :  { %1879 = vmatpush1.bf16.msra.mxu0 %v2733_v6 }
 0x296   :  { %1880 = vmatprep.subr.bf16.mxu0 %v2738_v7 }
 0x299   :  { %1881 = vmatpush1.bf16.msra.mxu0 %v2736_v8 }
 0x29a   :  { %1882 = vmatprep.subr.bf16.mxu0 %v2741_v9 }
 0x29d   :  { %1883 = vmatpush1.bf16.msra.mxu0 %v2739_v12 }
 0x29e   :  { %1884 = vmatprep.subr.bf16.mxu0 %v2744_v13 }
 0x2a1   :  { %1885 = vmatpush1.bf16.msra.mxu0 %v2742_v14 }
 0x2a4   :  { %1887 = vmatmul.mubr.bf16.vlgmr.msra.gmra.mrb[4].mxu0 %v1427_v15 }
 0x377   :  { %v1888_v39 = vpop.f32.mrb[4].mxu0 }
 0x378   :  { %v1895_v27 = vpack.c.bf16 %v1888_v39, %v1888_v39  ;;  %v1890_v28 = vpop.f32.mrb[5].mxu0 }
 0x379   :  { %v1896_v29 = vpack.c.bf16 %v1890_v28, %v1890_v28  ;;  %v1892_v30 = vpop.f32.mrb[6].mxu0 }
 0x37a   :  { %v1925_v31 = vadd.bf16 %v1917_v26, %v1895_v27  ;;  %v1893_v32 = vpop.f32.mrb[7].mxu0 }
 0x37b   :  { %v1926_v33 = vadd.bf16 %v1924_v11, %v1896_v29 }
 0x37c   :  { %v1927_v42 = vmax.bf16 %v2889_v0, %v1925_v31 }
 0x37d   :  { %v1928_v34 = vmax.bf16 %v2889_v0, %v1926_v33 }
 0x37f   :  { %2096 = vmatprep.mubr.bf16.mxu1 %v1928_v34 }
 0x380   :  { %2097 = vmatmul.mubr.bf16.vlgmr.msra.gmra.mrb[12].mxu1 %v1927_v42 }
 0x453   :  { %v2379_v35 = vpop.f32.mrb[12].mxu1 }
 0x454   :  { %v2380_v37 = vpop.f32.mrb[13].mxu1 }
 0x455   :  { %v2381_v40 = vadd.f32 %v2380_v37, %v2379_v35  ;;  %v2382_v38 = vpop.f32.mrb[14].mxu1 }
 0x456   :  { %v2383_v41 = vpop.f32.mrb[15].mxu1 }
 0x457   :  { %v2099_v43 = vadd.f32 %v2381_v40, %v2346_v36 }
 0x459   :  { %2104 = vst [vmem:[#allocation10] sm:$0xff] %v2099_v43 }
 0x45a   :  { %2860 = shalt.err (!%p2857_p8)
}
 0x45b   :  { %s2861_s8 = scalar_lea.hbm %s3088_s9, 128 }
 0x45c   :  { %p2862_p9 = scmp.ne.s32.totalorder %s3088_s9, %s2861_s8  ;;  %p2865_p10 = scmp.lt.u32.totalorder %s2861_s8, %s3088_s9 }
 0x45e   :  { %p2867_p11 = pnand %p2865_p10, %p2862_p9 }
 0x460   :  { %2870 = shalt.err (!%p2867_p11)
}
 0x461   :  { %2114 = dma.vmem_to_hbm [thread:$0]  %s2112_s1, 128, %s3088_s9, [#allocation4]  }
 0x462   :  { %2877 = dma.done.wait [#allocation4], 128  }
 0x463   :  { %2878 = vsyncadd [#allocation4], 4294967168 }
 0x464   :  { %2118 = vsyncpa [#allocation3], 1 }
 0x465   :  { %2119 = vsyncpa [#allocation6], 1 }
 0x466   :  { %2120 = vsyncpa [#allocation9], 1 }
 0x467   :  { %2121 = vsyncpa [#allocation4], 1 }

</bundles_post_ra>
